<compile_context>
chip_gen: v7x
topology: tpu7x:2x2x1
jax: 0.10.0
libtpu: 0.0.40
codegen_flags: <defaults>
</compile_context>

<pallas_src>
import jax
import jax.numpy as jnp
from jax.experimental import pallas as pl
from jax.experimental.pallas import tpu as pltpu


def _ffw_kernel(x_ref, w1_ref, b1_ref, w2_ref, b2_ref, o_ref, acc_ref):
    # x_ref: (tm, C) bf16, w1_ref: (C, th) bf16, b1_ref: (1, th) f32,
    # w2_ref: (th, C) bf16, b2_ref: (1, C) f32, o_ref: (tm, C), acc_ref: (tm, C) f32
    k = pl.program_id(1)

    @pl.when(k == 0)
    def _():
        acc_ref[...] = jnp.zeros_like(acc_ref)

    # First matmul tile on the MXU: (tm, C) @ (C, th) -> (tm, th), f32 accumulate.
    h = jnp.dot(x_ref[...], w1_ref[...], preferred_element_type=jnp.float32)
    h = jnp.maximum(h + b1_ref[...], 0.0)  # bias + ReLU (elementwise over H -> tileable)

    # Second matmul partial sum over the H tile: (tm, th) @ (th, C) -> (tm, C).
    acc_ref[...] += jnp.dot(h.astype(w2_ref.dtype), w2_ref[...],
                            preferred_element_type=jnp.float32)

    @pl.when(k == pl.num_programs(1) - 1)
    def _():
        # TODO(synk): nn.Dropout in training mode would need pltpu.prng_seed /
        # prng_random_bits; here we reproduce eval-mode semantics (identity).
        o_ref[...] = (acc_ref[...] + b2_ref[...]).astype(o_ref.dtype)


def _pick_tile(dim, candidates=(512, 256, 128)):
    """Largest MXU-friendly tile that divides `dim`, else the full extent."""
    for c in candidates:
        if dim % c == 0:
            return c
    return dim  # full extent is always a legal block shape


def feed_forward(x, w1, b1, w2, b2, *, tm=None, th=None,
                 compute_dtype=jnp.bfloat16):
    """x: (B, T, C) -> (B, T, C). Fused MLP in one Pallas kernel."""
    B, T, C = x.shape
    H = w1.shape[1]
    M = B * T

    # Row tile (M axis, "parallel") and hidden tile (H reduction axis).
    # Note: for v7x keep M//tm >= 2 when possible so both TensorCores get work.
    if tm is None:
        tm = _pick_tile(M)
    if th is None:
        th = _pick_tile(H)
    assert M % tm == 0 and H % th == 0, "tiles must divide the padded problem"

    # bf16 MXU operands; f32 biases (added on the f32 accumulation path).
    x2 = x.reshape(M, C).astype(compute_dtype)
    w1c = w1.astype(compute_dtype)
    w2c = w2.astype(compute_dtype)
    b1_2d = b1.reshape(1, H).astype(jnp.float32)
    b2_2d = b2.reshape(1, C).astype(jnp.float32)

    grid = (M // tm, H // th)

    itemsize = jnp.dtype(compute_dtype).itemsize
    cost = pl.CostEstimate(
        flops=4 * M * C * H,  # two matmuls: 2*M*C*H each
        transcendentals=0,
        bytes_accessed=(M * C * itemsize            # x
                        + C * H * itemsize          # W1
                        + H * C * itemsize          # W2
                        + 4 * (H + C)               # biases (f32)
                        + M * C * jnp.dtype(x.dtype).itemsize),  # output
    )

    out = pl.pallas_call(
        _ffw_kernel,
        out_shape=jax.ShapeDtypeStruct((M, C), x.dtype),
        grid_spec=pltpu.PrefetchScalarGridSpec(
            num_scalar_prefetch=0,
            grid=grid,
            in_specs=[
                pl.BlockSpec((tm, C), lambda i, k: (i, 0)),   # x rows (constant over k)
                pl.BlockSpec((C, th), lambda i, k: (0, k)),   # W1 column tile
                pl.BlockSpec((1, th), lambda i, k: (0, k)),   # b1 tile
                pl.BlockSpec((th, C), lambda i, k: (k, 0)),   # W2 row tile
                pl.BlockSpec((1, C), lambda i, k: (0, 0)),    # b2
            ],
            out_specs=pl.BlockSpec((tm, C), lambda i, k: (i, 0)),
            scratch_shapes=[pltpu.VMEM((tm, C), jnp.float32)],  # f32 accumulator
        ),
        compiler_params=pltpu.CompilerParams(
            dimension_semantics=("parallel", "arbitrary"),
            # Above the 16/32 MiB scoped defaults, with headroom under v7x's
            # 64 MiB physical VMEM (v5e/v6e have 128 MiB).
            vmem_limit_bytes=48 * 1024 * 1024,
        ),
        cost_estimate=cost,
    )(x2, w1c, b1_2d, w2c, b2_2d)
    return out.reshape(B, T, C)


def _init_params(key, n_embd, dtype=jnp.float32):
    """Deterministic init mirroring nn.Linear default (uniform +/- 1/sqrt(fan_in))."""
    hidden = 4 * n_embd
    k1, k2, k3, k4 = jax.random.split(key, 4)
    lim1 = 1.0 / jnp.sqrt(n_embd)
    lim2 = 1.0 / jnp.sqrt(hidden)
    w1 = jax.random.uniform(k1, (n_embd, hidden), dtype, -lim1, lim1)
    b1 = jax.random.uniform(k2, (hidden,), dtype, -lim1, lim1)
    w2 = jax.random.uniform(k3, (hidden, n_embd), dtype, -lim2, lim2)
    b2 = jax.random.uniform(k4, (n_embd,), dtype, -lim2, lim2)
    return w1, b1, w2, b2


if __name__ == "__main__":
    # Small config: batch=2, seq=8, n_embd=32 (hidden = 128).
    B, T, n_embd = 2, 8, 32
    key = jax.random.PRNGKey(0)
    kx, kp = jax.random.split(key)
    x = jax.random.normal(kx, (B, T, n_embd), jnp.float32)
    w1, b1, w2, b2 = _init_params(kp, n_embd)

    y = jax.block_until_ready(feed_forward(x, w1, b1, w2, b2))
    assert y.shape == (B, T, n_embd)
    assert y.dtype == x.dtype

    # Reference with matching bf16 operand precision (f32 accumulation / biases).
    rd = lambda a: a.astype(jnp.bfloat16).astype(jnp.float32)
    x2 = x.reshape(-1, n_embd)
    h_ref = jnp.maximum(rd(x2) @ rd(w1) + b1, 0.0)
    ref = (rd(h_ref) @ rd(w2) + b2).reshape(B, T, n_embd)
    assert jnp.allclose(y, ref, atol=1e-4, rtol=1e-4), float(jnp.max(jnp.abs(y - ref)))

    # Loose check vs. the pure-f32 PyTorch-equivalent forward (bf16 operand error only).
    ref_f32 = (jnp.maximum(x2 @ w1 + b1, 0.0) @ w2 + b2).reshape(B, T, n_embd)
    assert jnp.allclose(y, ref_f32, atol=5e-2, rtol=5e-2)

    print("KERNEL_OK")
</pallas_src>

<mosaic_0001>
module attributes {stable_mosaic.version = 11 : i64} {
  func.func @_ffw_kernel(%arg0: i32, %arg1: i32, %arg2: memref<16x32xbf16, #tpu.memory_space<vmem>>, %arg3: memref<32x128xbf16, #tpu.memory_space<vmem>>, %arg4: memref<1x128xf32, #tpu.memory_space<vmem>>, %arg5: memref<128x32xbf16, #tpu.memory_space<vmem>>, %arg6: memref<1x32xf32, #tpu.memory_space<vmem>>, %arg7: memref<16x32xf32, #tpu.memory_space<vmem>>, %arg8: memref<16x32xf32, #tpu.memory_space<vmem>>) attributes {dimension_semantics = [#tpu.dimension_semantics<parallel>, #tpu.dimension_semantics<arbitrary>], iteration_bounds = array<i64: 1, 1>, scalar_prefetch = 0 : i64, scratch_operands = 1 : i64, tpu.core_type = #tpu.core_type<tc>, window_params = [{transform_indices = @transform_0, window_bounds = array<i64: 16, 32>}, {transform_indices = @transform_1, window_bounds = array<i64: 32, 128>}, {transform_indices = @transform_2, window_bounds = array<i64: 1, 128>}, {transform_indices = @transform_3, window_bounds = array<i64: 128, 32>}, {pipeline_mode = #tpu.pipeline_mode<synchronous>, transform_indices = @transform_4, window_bounds = array<i64: 1, 32>}, {transform_indices = @transform_5, window_bounds = array<i64: 16, 32>}]} {
    %c0_i32 = arith.constant 0 : i32
    %0 = arith.cmpi eq, %arg1, %c0_i32 : i32
    %1 = arith.extui %0 : i1 to i32
    %c0_i32_0 = arith.constant 0 : i32
    %2 = arith.cmpi ne, %1, %c0_i32_0 : i32
    scf.if %2 {
      %cst_16 = arith.constant 0.000000e+00 : f32
      %20 = vector.broadcast %cst_16 : f32 to vector<16x32xf32>
      %c0_17 = arith.constant 0 : index
      %c0_18 = arith.constant 0 : index
      %21 = vector.load %arg8[%c0_17, %c0_18] : memref<16x32xf32, #tpu.memory_space<vmem>>, vector<16x32xf32>
      tpu.vector_store %arg8[%c0_17, %c0_18], %20 {strides = array<i32>} : memref<16x32xf32, #tpu.memory_space<vmem>>, vector<16x32xf32>,
    } else {
    }
    %c0 = arith.constant 0 : index
    %c0_1 = arith.constant 0 : index
    %3 = vector.load %arg2[%c0, %c0_1] : memref<16x32xbf16, #tpu.memory_space<vmem>>, vector<16x32xbf16>
    %c0_2 = arith.constant 0 : index
    %c0_3 = arith.constant 0 : index
    %4 = vector.load %arg3[%c0_2, %c0_3] : memref<32x128xbf16, #tpu.memory_space<vmem>>, vector<32x128xbf16>
    %cst = arith.constant dense<0.000000e+00> : vector<16x128xf32>
    %5 = tpu.matmul %3, %4, %cst {dimension_numbers = #tpu.dot_dimension_numbers<[1], [0], [0], [1], [0, 0, 1, 1], [], []>} : vector<16x32xbf16>, vector<32x128xbf16>, vector<16x128xf32> -> vector<16x128xf32>
    %c0_4 = arith.constant 0 : index
    %c0_5 = arith.constant 0 : index
    %6 = vector.load %arg4[%c0_4, %c0_5] : memref<1x128xf32, #tpu.memory_space<vmem>>, vector<1x128xf32>
    %7 = vector.broadcast %6 : vector<1x128xf32> to vector<16x128xf32>
    %8 = arith.addf %5, %7 : vector<16x128xf32>
    %cst_6 = arith.constant 0.000000e+00 : f32
    %9 = vector.broadcast %cst_6 : f32 to vector<16x128xf32>
    %10 = arith.maximumf %8, %9 : vector<16x128xf32>
    %c0_7 = arith.constant 0 : index
    %c0_8 = arith.constant 0 : index
    %11 = vector.load %arg8[%c0_7, %c0_8] : memref<16x32xf32, #tpu.memory_space<vmem>>, vector<16x32xf32>
    %12 = arith.truncf %10 : vector<16x128xf32> to vector<16x128xbf16>
    %c0_9 = arith.constant 0 : index
    %c0_10 = arith.constant 0 : index
    %13 = vector.load %arg5[%c0_9, %c0_10] : memref<128x32xbf16, #tpu.memory_space<vmem>>, vector<128x32xbf16>
    %cst_11 = arith.constant dense<0.000000e+00> : vector<16x32xf32>
    %14 = tpu.matmul %12, %13, %cst_11 {dimension_numbers = #tpu.dot_dimension_numbers<[1], [0], [0], [1], [0, 0, 1, 1], [], []>} : vector<16x128xbf16>, vector<128x32xbf16>, vector<16x32xf32> -> vector<16x32xf32>
    %15 = arith.addf %11, %14 : vector<16x32xf32>
    %c0_12 = arith.constant 0 : index
    %c0_13 = arith.constant 0 : index
    %16 = vector.load %arg8[%c0_12, %c0_13] : memref<16x32xf32, #tpu.memory_space<vmem>>, vector<16x32xf32>
    tpu.vector_store %arg8[%c0_12, %c0_13], %15 {strides = array<i32>} : memref<16x32xf32, #tpu.memory_space<vmem>>, vector<16x32xf32>,
    %c0_i32_14 = arith.constant 0 : i32
    %17 = arith.cmpi eq, %arg1, %c0_i32_14 : i32
    %18 = arith.extui %17 : i1 to i32
    %c0_i32_15 = arith.constant 0 : i32
    %19 = arith.cmpi ne, %18, %c0_i32_15 : i32
    scf.if %19 {
      %c0_16 = arith.constant 0 : index
      %c0_17 = arith.constant 0 : index
      %20 = vector.load %arg8[%c0_16, %c0_17] : memref<16x32xf32, #tpu.memory_space<vmem>>, vector<16x32xf32>
      %c0_18 = arith.constant 0 : index
      %c0_19 = arith.constant 0 : index
      %21 = vector.load %arg6[%c0_18, %c0_19] : memref<1x32xf32, #tpu.memory_space<vmem>>, vector<1x32xf32>
      %22 = vector.broadcast %21 : vector<1x32xf32> to vector<16x32xf32>
      %23 = arith.addf %20, %22 : vector<16x32xf32>
      %c0_20 = arith.constant 0 : index
      %c0_21 = arith.constant 0 : index
      %24 = vector.load %arg7[%c0_20, %c0_21] : memref<16x32xf32, #tpu.memory_space<vmem>>, vector<16x32xf32>
      tpu.vector_store %arg7[%c0_20, %c0_21], %23 {strides = array<i32>} : memref<16x32xf32, #tpu.memory_space<vmem>>, vector<16x32xf32>,
    } else {
    }
    return
  }
  func.func @transform_0(%arg0: i32, %arg1: i32) -> (i32, i32) {
    %c0_i32 = arith.constant 0 : i32
    %c0_i32_0 = arith.constant 0 : i32
    return %arg0, %c0_i32 : i32, i32
  }
  func.func @transform_1(%arg0: i32, %arg1: i32) -> (i32, i32) {
    %c0_i32 = arith.constant 0 : i32
    %c0_i32_0 = arith.constant 0 : i32
    return %c0_i32, %arg1 : i32, i32
  }
  func.func @transform_2(%arg0: i32, %arg1: i32) -> (i32, i32) {
    %c0_i32 = arith.constant 0 : i32
    %c0_i32_0 = arith.constant 0 : i32
    return %c0_i32, %arg1 : i32, i32
  }
  func.func @transform_3(%arg0: i32, %arg1: i32) -> (i32, i32) {
    %c0_i32 = arith.constant 0 : i32
    %c0_i32_0 = arith.constant 0 : i32
    return %arg1, %c0_i32 : i32, i32
  }
  func.func @transform_4(%arg0: i32, %arg1: i32) -> (i32, i32) {
    %c0_i32 = arith.constant 0 : i32
    %c0_i32_0 = arith.constant 0 : i32
    %c0_i32_1 = arith.constant 0 : i32
    return %c0_i32, %c0_i32_0 : i32, i32
  }
  func.func @transform_5(%arg0: i32, %arg1: i32) -> (i32, i32) {
    %c0_i32 = arith.constant 0 : i32
    %c0_i32_0 = arith.constant 0 : i32
    return %arg0, %c0_i32 : i32, i32
  }
}

</mosaic_0001>

<bundles_post_ra>
// kernel: tpu_custom_call.1
= control target key start
LH: loop header
LB: loop body
LE: loop exit
PB: predicated region body
PF: predicated region fallthrough
CT: control target
= control target key end

     0   :  { %v344_v1 = vmov 0.0   ;;  %vm345_vm0 = vmmov 0   ;;  %vm26_vm1 = vcmask 261120   ;;  %s437_s0 = inlined_call_operand.vmem [shape: bf16[16,32], index: 0, kind: input, shape index: {}]   ;;  %s438_s1 = inlined_call_operand.vmem [shape: bf16[32,128], index: 1, kind: input, shape index: {}]   ;;  %s439_s2 = inlined_call_operand.vmem [shape: f32[1,128], index: 2, kind: input, shape index: {}]   ;;  %s440_s3 = inlined_call_operand.vmem [shape: bf16[128,32], index: 3, kind: input, shape index: {}]   ;;  %s441_s4 = inlined_call_operand.vmem [shape: f32[1,32], index: 4, kind: input, shape index: {}]   ;;  %s442_s5 = inlined_call_operand.hbm [shape: f32[16,32], index: 5, kind: output, shape index: {}]  }
   0x1   :  { %v309_v0 = vld [vmem:[%s438_s1] sm:$0xff]   ;;  %276 = vmatprep.subr.bf16.mxu0 %v344_v1  ;;  %284 = vmatprep.subr.bf16.mxu1 %v344_v1  ;;  %v310_v2 = vld [vmem:[%s438_s1 + $0x8] sm:$0xff]   ;;  %27 = vst.msk [vmem:[#allocation2] sm:$0xff] %vm26_vm1, %v344_v1  ;;  %28 = vst.msk [vmem:[#allocation2 + $0x8] sm:$0xff] %vm26_vm1, %v344_v1 }
   0x2   :  { %277 = vmatpush3.bf16.msra.mxu0 %v309_v0  ;;  %280 = vmatprep.mubr.msk.bf16.mxu0 %vm345_vm0, %v344_v1  ;;  %v312_v3 = vld [vmem:[%s440_s3] sm:$0xff]   ;;  %v313_v5 = vld [vmem:[%s440_s3 + $0x8] sm:$0xff]   ;;  %v314_v6 = vld [vmem:[%s440_s3 + $0x10] sm:$0xff]  }
   0x3   :  { %278 = vmatprep.subr.bf16.mxu0 %v344_v1  ;;  %300 = vmatprep.mubr.msk.bf16.mxu1 %vm345_vm0, %v344_v1  ;;  %v311_v4 = vld [vmem:[%s437_s0] sm:$0xff]  }
   0x4   :  { %285 = vmatpush3.bf16.msra.mxu1 %v312_v3 }
   0x5   :  { %286 = vmatprep.subr.bf16.mxu1 %v344_v1 }
   0x6   :  { %279 = vmatpush3.bf16.msra.mxu0 %v310_v2 }
   0x8   :  { %287 = vmatpush3.bf16.msra.mxu1 %v313_v5 }
   0x9   :  { %281 = vmatmul.mubr.msk.bf16.vlgmr.msra.gmra.mrb[0].mxu0 %vm26_vm1, %v311_v4  ;;  %288 = vmatprep.subr.bf16.mxu1 %v344_v1 }
   0xa   :  { %10 = vsyncpa [#allocation4], 0  ;;  %v315_v7 = vld [vmem:[%s440_s3 + $0x18] sm:$0xff]   ;;  %v316_v8 = vld [vmem:[%s440_s3 + $0x20] sm:$0xff]   ;;  %s346_s15 = smov [#allocation3]  }
   0xb   :  { %v317_v9 = vld [vmem:[%s440_s3 + $0x28] sm:$0xff]   ;;  %v318_v10 = vld [vmem:[%s440_s3 + $0x30] sm:$0xff]   ;;  %v319_v11 = vld [vmem:[%s440_s3 + $0x38] sm:$0xff]   ;;  %s239_s16 = sshll.u32 %s346_s15, 4  ;;  %s240_s16 = int_to_ptr.vmem [resolvable:$true] %s239_s16 }
   0xc   :  { %289 = vmatpush3.bf16.msra.mxu1 %v314_v6  ;;  %v250_v12 = vld [vmem:[%s439_s2] ss:$0 sm:$0xff]  ;;  %v107_v24 = vld [vmem:[#allocation2 + $0x8] sm:$0xff]  ;;  %s320_s17 = scalar_lea.vmem %s240_s16, 256  ;;  %p325_p1 = scmp.lt.s32.totalorder %s240_s16, %s240_s16 }
   0xd   :  { %290 = vmatprep.subr.bf16.mxu1 %v344_v1  ;;  %v106_v22 = vld [vmem:[#allocation2] sm:$0xff]  ;;  %p321_p0 = scmp.ne.s32.totalorder %s240_s16, %s320_s17  ;;  %p326_p2 = scmp.lt.s32.totalorder %s320_s17, %s320_s17 }
   0xe   :  { %v263_v30 = vld [vmem:[%s441_s4] ss:$0 sm:$0xff] }
   0xf   :  { %p327_p3 = por %p326_p2, %p325_p1 }
  0x10   :  { %291 = vmatpush3.bf16.msra.mxu1 %v315_v7 }
  0x11   :  { %292 = vmatprep.subr.bf16.mxu1 %v344_v1  ;;  %p328_p4 = pnand %p327_p3, %p321_p0 }
  0x14   :  { %293 = vmatpush3.bf16.msra.mxu1 %v316_v8 }
  0x15   :  { %294 = vmatprep.subr.bf16.mxu1 %v344_v1 }
  0x18   :  { %295 = vmatpush3.bf16.msra.mxu1 %v317_v9 }
  0x19   :  { %296 = vmatprep.subr.bf16.mxu1 %v344_v1 }
  0x1c   :  { %297 = vmatpush3.bf16.msra.mxu1 %v318_v10 }
  0x1d   :  { %298 = vmatprep.subr.bf16.mxu1 %v344_v1 }
  0x20   :  { %299 = vmatpush3.bf16.msra.mxu1 %v319_v11 }
  0xdc   :  { %v97_v13 = vpop.f32.mrb[0].mxu0 }
  0xdd   :  { %v98_v14 = vadd.f32 %v250_v12, %v97_v13  ;;  %v282_v15 = vpop.f32.mrb[1].mxu0 }
  0xde   :  { %v100_v16 = vpop.f32.mrb[2].mxu0 }
  0xdf   :  { %v101_v17 = vadd.f32 %v250_v12, %v100_v16  ;;  %v283_v18 = vpop.f32.mrb[3].mxu0  ;;  %v104_v19 = vmax.f32 %v98_v14, 0.0 }
  0xe1   :  { %v105_v20 = vmax.f32 %v101_v17, 0.0 }
  0xe3   :  { %v108_v21 = vpack.c.bf16 %v105_v20, %v104_v19 }
  0xe5   :  { %301 = vmatmul.mubr.bf16.vlgmr.msra.gmra.mrb[0].mxu1 %v108_v21 }
 0x1b8   :  { %v207_v23 = vpop.f32.mrb[0].mxu1 }
 0x1b9   :  { %v214_v25 = vadd.f32 %v207_v23, %v106_v22  ;;  %v302_v26 = vpop.f32.mrb[1].mxu1 }
 0x1ba   :  { %v210_v27 = vpop.f32.mrb[2].mxu1 }
 0x1bb   :  { %216 = vst.msk [vmem:[#allocation2] sm:$0xff] %vm26_vm1, %v214_v25  ;;  %v215_v28 = vadd.f32 %v210_v27, %v107_v24  ;;  %v303_v29 = vpop.f32.mrb[3].mxu1 }
 0x1bd   :  { %217 = vst.msk [vmem:[#allocation2 + $0x8] sm:$0xff] %vm26_vm1, %v215_v28 }
 0x1c2   :  { %v221_v31 = vld [vmem:[#allocation2] sm:$0xff] }
 0x1c3   :  { %v230_v32 = vadd.f32 %v263_v30, %v221_v31 }
 0x1c4   :  { %v222_v33 = vld [vmem:[#allocation2 + $0x8] sm:$0xff] }
 0x1c5   :  { %v231_v34 = vadd.f32 %v263_v30, %v222_v33  ;;  %232 = vst.msk [vmem:[#allocation3] sm:$0xff] %vm26_vm1, %v230_v32 }
 0x1c7   :  { %233 = vst.msk [vmem:[#allocation3 + $0x8] sm:$0xff] %vm26_vm1, %v231_v34 }
 0x1c8   :  { %331 = shalt.err (!%p328_p4)
}
 0x1c9   :  { %s332_s19 = scalar_lea.hbm %s442_s5, 256 }
 0x1ca   :  { %p333_p5 = scmp.ne.s32.totalorder %s442_s5, %s332_s19  ;;  %p336_p6 = scmp.lt.u32.totalorder %s332_s19, %s442_s5 }
 0x1cc   :  { %p338_p7 = pnand %p336_p6, %p333_p5 }
 0x1ce   :  { %341 = shalt.err (!%p338_p7)
}
 0x1cf   :  { %s347_s24 = smov 128   ;;  %s348_s25 = smov 8  }
 0x1d0   :  { %245 = dma.vmem_to_hbm [thread:$0]  %s240_s16, 256, %s442_s5, [#allocation4], %s347_s24, %s347_s24, %s348_s25  }
 0x1d1   :  { %342 = dma.done.wait [#allocation4], 256  }
 0x1d2   :  { %343 = vsyncadd [#allocation4], 4294967040 }
 0x1d3   :  { %249 = vsyncpa [#allocation4], 1 }

</bundles_post_ra>
